<compile_context>
chip_gen: v7x
topology: tpu7x:2x2x1
jax: 0.10.0
libtpu: 0.0.40
codegen_flags: <defaults>
</compile_context>

<pallas_src>
import functools

import jax
import jax.numpy as jnp
import numpy as np
from jax.experimental import pallas as pl
from jax.experimental.pallas import tpu as pltpu

EPS = 1e-8


def _round_up(n, m):
    return ((n + m - 1) // m) * m


def _ffn_kernel(x_ref, w1t_ref, w2t_ref, vec_ref, o_ref, *, inv_h, n_pad):
    """x_ref: (TM, Hp) rows.  w*t_ref: (Hp, Hp) pre-transposed weights.
    vec_ref: (8, Hp) packed [gamma1, beta1, b1, gamma2, beta2, b2, 0, 0].
    Padded lanes of x / params are zero, so LN stats use inv_h / n_pad correction."""
    x = x_ref[...].astype(jnp.float32)

    # shared per-row statistics (both LayerNorms normalize the same x);
    # correct for the (Hp - H) zero-padded lanes.
    mu = jnp.sum(x, axis=-1, keepdims=True) * inv_h
    d = x - mu
    ssq = jnp.sum(d * d, axis=-1, keepdims=True)
    var = jnp.maximum((ssq - n_pad * mu * mu) * inv_h, 0.0)
    xhat = d * jax.lax.rsqrt(var + EPS)

    g1 = vec_ref[0:1, :]
    be1 = vec_ref[1:2, :]
    b1 = vec_ref[2:3, :]
    g2 = vec_ref[3:4, :]
    be2 = vec_ref[4:5, :]
    b2 = vec_ref[5:6, :]

    mm_dt = w1t_ref.dtype  # f32 or bf16; accumulation is always f32

    # LayerNorm1 -> FC1 -> ReLU -> FC2   (weights already transposed: y = h @ W.T)
    h = xhat * g1 + be1
    h = jnp.dot(h.astype(mm_dt), w1t_ref[...], preferred_element_type=jnp.float32) + b1
    h = jnp.maximum(h, 0.0)
    h = jnp.dot(h.astype(mm_dt), w2t_ref[...], preferred_element_type=jnp.float32) + b2

    # residual branch: LayerNorm2(x)
    res = xhat * g2 + be2

    o_ref[...] = (h + res).astype(o_ref.dtype)


def pointwise_feedforward(x, params, *, tm=256, matmul_dtype=jnp.float32):
    """x: (B, S, H) float32.  params: dict from init_params.

    matmul_dtype: jnp.float32 (exact) or jnp.bfloat16 (v6e/v7x MXU-peak GEMMs,
    f32 accumulation; LN / bias / ReLU / residual stay f32)."""
    B, S, H = x.shape
    N = B * S

    Hp = _round_up(H, 128)                       # lane-dense feature dim
    tm_eff = _round_up(min(tm, _round_up(N, 8)), 8)
    Np = _round_up(N, tm_eff)                    # zero-pad rows: no LN on garbage tails

    x2p = jnp.pad(x.reshape(N, H).astype(jnp.float32),
                  ((0, Np - N), (0, Hp - H)))

    # Pre-transposed + zero-padded weights (torch Linear: y = x @ W.T + b).
    def _pad_w(w):
        return jnp.pad(w.astype(jnp.float32), ((0, Hp - H), (0, Hp - H)))

    w1t = _pad_w(params["w1"]).T.astype(matmul_dtype)
    w2t = _pad_w(params["w2"]).T.astype(matmul_dtype)

    # Fold the six (H,) vectors into one (8, Hp) packed block (single DMA stream).
    vecs = jnp.zeros((8, Hp), jnp.float32)
    for r, name in enumerate(("gamma1", "beta1", "b1", "gamma2", "beta2", "b2")):
        vecs = vecs.at[r, :H].set(params[name].astype(jnp.float32))

    grid = (Np // tm_eff,)
    row_spec = pl.BlockSpec((tm_eff, Hp), lambda i: (i, 0))

    # VMEM budget (worst case: weights double-buffered) with headroom, capped at
    # 64 MiB so the request is legal on every generation (v7x has 64 MiB / TC).
    wbytes = np.dtype(matmul_dtype).itemsize
    need = (2 * 2 * Hp * Hp * wbytes          # two (Hp,Hp) weight blocks
            + 2 * 2 * tm_eff * Hp * 4         # x / out row tiles, double-buffered
            + 2 * 8 * Hp * 4                  # packed vectors
            + 4 * tm_eff * Hp * 4)            # live f32 intermediates headroom
    vmem_limit = int(min(max(need * 5 // 4, 32 * 1024 * 1024), 64 * 1024 * 1024))

    kern = functools.partial(_ffn_kernel, inv_h=1.0 / H, n_pad=float(Hp - H))

    def build(weight_mode):
        def const_spec(shape):
            if weight_mode is None:
                return pl.BlockSpec(shape, lambda i: (0, 0))
            return pl.BlockSpec(shape, lambda i: (0, 0), pipeline_mode=weight_mode)

        return pl.pallas_call(
            kern,
            out_shape=jax.ShapeDtypeStruct((Np, Hp), x.dtype),
            grid_spec=pltpu.PrefetchScalarGridSpec(
                num_scalar_prefetch=0,
                grid=grid,
                in_specs=[row_spec,
                          const_spec((Hp, Hp)),     # w1.T
                          const_spec((Hp, Hp)),     # w2.T
                          const_spec((8, Hp))],     # packed vectors
                out_specs=row_spec,
            ),
            compiler_params=pltpu.CompilerParams(
                dimension_semantics=("parallel",),
                vmem_limit_bytes=vmem_limit,
            ),
        )

    try:
        # grid-invariant weight/vector blocks single-buffered -> halves weight VMEM
        out2p = build(pl.Buffered(1))(x2p, w1t, w2t, vecs)
    except Exception:
        # fallback: default (double) buffering if single-buffering is unsupported
        out2p = build(None)(x2p, w1t, w2t, vecs)

    return out2p[:N, :H].reshape(B, S, H)


def init_params(key, hidden_units):
    k1, k2, k3, k4 = jax.random.split(key, 4)
    bound = 1.0 / jnp.sqrt(hidden_units)
    return {
        "w1": jax.random.uniform(k1, (hidden_units, hidden_units),
                                 jnp.float32, -bound, bound),
        "b1": jax.random.uniform(k2, (hidden_units,), jnp.float32, -bound, bound),
        "w2": jax.random.uniform(k3, (hidden_units, hidden_units),
                                 jnp.float32, -bound, bound),
        "b2": jax.random.uniform(k4, (hidden_units,), jnp.float32, -bound, bound),
        "gamma1": jnp.ones((hidden_units,), jnp.float32),
        "beta1": jnp.zeros((hidden_units,), jnp.float32),
        "gamma2": jnp.ones((hidden_units,), jnp.float32),
        "beta2": jnp.zeros((hidden_units,), jnp.float32),
    }


def _reference(x, p):
    def ln(v, g, b):
        mu = jnp.mean(v, axis=-1, keepdims=True)
        var = jnp.mean((v - mu) ** 2, axis=-1, keepdims=True)
        return (v - mu) / jnp.sqrt(var + EPS) * g + b

    h = ln(x, p["gamma1"], p["beta1"])
    h = jnp.maximum(h @ p["w1"].T + p["b1"], 0.0)
    h = h @ p["w2"].T + p["b2"]
    return h + ln(x, p["gamma2"], p["beta2"])


if __name__ == "__main__":
    B, S, H = 2, 8, 32
    key = jax.random.PRNGKey(0)
    kx, kp = jax.random.split(key)
    x = jax.random.normal(kx, (B, S, H), jnp.float32)
    params = init_params(kp, H)

    ref = _reference(x, params)

    # f32-GEMM path: exact match with the reference.
    out = pointwise_feedforward(x, params)
    jax.block_until_ready(out)
    assert out.shape == (B, S, H)
    assert jnp.allclose(out, ref, atol=2e-5, rtol=2e-5)

    # bf16-weight GEMM path (v6e/v7x MXU peak), f32 accumulation: loose check.
    out_bf16 = pointwise_feedforward(x, params, matmul_dtype=jnp.bfloat16)
    jax.block_until_ready(out_bf16)
    assert out_bf16.shape == (B, S, H)
    assert jnp.allclose(out_bf16, ref, atol=1e-1, rtol=1e-1)

    print("KERNEL_OK")
</pallas_src>

<mosaic_0001>
module attributes {stable_mosaic.version = 11 : i64} {
  func.func @_ffn_kernel(%arg0: i32, %arg1: memref<16x128xf32, #tpu.memory_space<vmem>>, %arg2: memref<128x128xf32, #tpu.memory_space<vmem>>, %arg3: memref<128x128xf32, #tpu.memory_space<vmem>>, %arg4: memref<8x128xf32, #tpu.memory_space<vmem>>, %arg5: memref<16x128xf32, #tpu.memory_space<vmem>>) attributes {dimension_semantics = [#tpu.dimension_semantics<parallel>], iteration_bounds = array<i64: 1>, scalar_prefetch = 0 : i64, scratch_operands = 0 : i64, tpu.core_type = #tpu.core_type<tc>, window_params = [{transform_indices = @transform_0, window_bounds = array<i64: 16, 128>}, {pipeline_mode = #tpu.pipeline_mode<synchronous>, transform_indices = @transform_1, window_bounds = array<i64: 128, 128>}, {pipeline_mode = #tpu.pipeline_mode<synchronous>, transform_indices = @transform_2, window_bounds = array<i64: 128, 128>}, {pipeline_mode = #tpu.pipeline_mode<synchronous>, transform_indices = @transform_3, window_bounds = array<i64: 8, 128>}, {transform_indices = @transform_4, window_bounds = array<i64: 16, 128>}]} {
    %c0 = arith.constant 0 : index
    %c0_0 = arith.constant 0 : index
    %0 = vector.load %arg1[%c0, %c0_0] : memref<16x128xf32, #tpu.memory_space<vmem>>, vector<16x128xf32>
    %cst = arith.constant dense<0.000000e+00> : vector<16xf32>
    %1 = vector.multi_reduction <add>, %0, %cst [1] : vector<16x128xf32> to vector<16xf32>
    %2 = vector.shape_cast %1 : vector<16xf32> to vector<16x1xf32>
    %cst_1 = arith.constant 3.125000e-02 : f32
    %3 = vector.broadcast %cst_1 : f32 to vector<16x1xf32>
    %4 = arith.mulf %2, %3 : vector<16x1xf32>
    %5 = vector.broadcast %4 : vector<16x1xf32> to vector<16x128xf32>
    %6 = arith.subf %0, %5 : vector<16x128xf32>
    %7 = arith.mulf %6, %6 : vector<16x128xf32>
    %cst_2 = arith.constant dense<0.000000e+00> : vector<16xf32>
    %8 = vector.multi_reduction <add>, %7, %cst_2 [1] : vector<16x128xf32> to vector<16xf32>
    %9 = vector.shape_cast %8 : vector<16xf32> to vector<16x1xf32>
    %cst_3 = arith.constant 9.600000e+01 : f32
    %10 = vector.broadcast %cst_3 : f32 to vector<16x1xf32>
    %11 = arith.mulf %10, %4 : vector<16x1xf32>
    %12 = arith.mulf %11, %4 : vector<16x1xf32>
    %13 = arith.subf %9, %12 : vector<16x1xf32>
    %cst_4 = arith.constant 3.125000e-02 : f32
    %14 = vector.broadcast %cst_4 : f32 to vector<16x1xf32>
    %15 = arith.mulf %13, %14 : vector<16x1xf32>
    %cst_5 = arith.constant 0.000000e+00 : f32
    %16 = vector.broadcast %cst_5 : f32 to vector<16x1xf32>
    %17 = arith.maximumf %15, %16 : vector<16x1xf32>
    %cst_6 = arith.constant 9.99999993E-9 : f32
    %18 = vector.broadcast %cst_6 : f32 to vector<16x1xf32>
    %19 = arith.addf %17, %18 : vector<16x1xf32>
    %20 = math.rsqrt %19 : vector<16x1xf32>
    %21 = vector.broadcast %20 : vector<16x1xf32> to vector<16x128xf32>
    %22 = arith.mulf %6, %21 : vector<16x128xf32>
    %c0_7 = arith.constant 0 : index
    %c0_8 = arith.constant 0 : index
    %23 = vector.load %arg4[%c0_7, %c0_8] : memref<8x128xf32, #tpu.memory_space<vmem>>, vector<1x128xf32>
    %c1 = arith.constant 1 : index
    %c0_9 = arith.constant 0 : index
    %24 = vector.load %arg4[%c1, %c0_9] : memref<8x128xf32, #tpu.memory_space<vmem>>, vector<1x128xf32>
    %c2 = arith.constant 2 : index
    %c0_10 = arith.constant 0 : index
    %25 = vector.load %arg4[%c2, %c0_10] : memref<8x128xf32, #tpu.memory_space<vmem>>, vector<1x128xf32>
    %c3 = arith.constant 3 : index
    %c0_11 = arith.constant 0 : index
    %26 = vector.load %arg4[%c3, %c0_11] : memref<8x128xf32, #tpu.memory_space<vmem>>, vector<1x128xf32>
    %c4 = arith.constant 4 : index
    %c0_12 = arith.constant 0 : index
    %27 = vector.load %arg4[%c4, %c0_12] : memref<8x128xf32, #tpu.memory_space<vmem>>, vector<1x128xf32>
    %c5 = arith.constant 5 : index
    %c0_13 = arith.constant 0 : index
    %28 = vector.load %arg4[%c5, %c0_13] : memref<8x128xf32, #tpu.memory_space<vmem>>, vector<1x128xf32>
    %29 = vector.broadcast %23 : vector<1x128xf32> to vector<16x128xf32>
    %30 = arith.mulf %22, %29 : vector<16x128xf32>
    %31 = vector.broadcast %24 : vector<1x128xf32> to vector<16x128xf32>
    %32 = arith.addf %30, %31 : vector<16x128xf32>
    %c0_14 = arith.constant 0 : index
    %c0_15 = arith.constant 0 : index
    %33 = vector.load %arg2[%c0_14, %c0_15] : memref<128x128xf32, #tpu.memory_space<vmem>>, vector<128x128xf32>
    %cst_16 = arith.constant dense<0.000000e+00> : vector<16x128xf32>
    %34 = tpu.matmul %32, %33, %cst_16 {dimension_numbers = #tpu.dot_dimension_numbers<[1], [0], [0], [1], [0, 0, 1, 1], [], []>} : vector<16x128xf32>, vector<128x128xf32>, vector<16x128xf32> -> vector<16x128xf32>
    %35 = vector.broadcast %25 : vector<1x128xf32> to vector<16x128xf32>
    %36 = arith.addf %34, %35 : vector<16x128xf32>
    %cst_17 = arith.constant 0.000000e+00 : f32
    %37 = vector.broadcast %cst_17 : f32 to vector<16x128xf32>
    %38 = arith.maximumf %36, %37 : vector<16x128xf32>
    %c0_18 = arith.constant 0 : index
    %c0_19 = arith.constant 0 : index
    %39 = vector.load %arg3[%c0_18, %c0_19] : memref<128x128xf32, #tpu.memory_space<vmem>>, vector<128x128xf32>
    %cst_20 = arith.constant dense<0.000000e+00> : vector<16x128xf32>
    %40 = tpu.matmul %38, %39, %cst_20 {dimension_numbers = #tpu.dot_dimension_numbers<[1], [0], [0], [1], [0, 0, 1, 1], [], []>} : vector<16x128xf32>, vector<128x128xf32>, vector<16x128xf32> -> vector<16x128xf32>
    %41 = vector.broadcast %28 : vector<1x128xf32> to vector<16x128xf32>
    %42 = arith.addf %40, %41 : vector<16x128xf32>
    %43 = vector.broadcast %26 : vector<1x128xf32> to vector<16x128xf32>
    %44 = arith.mulf %22, %43 : vector<16x128xf32>
    %45 = vector.broadcast %27 : vector<1x128xf32> to vector<16x128xf32>
    %46 = arith.addf %44, %45 : vector<16x128xf32>
    %47 = arith.addf %42, %46 : vector<16x128xf32>
    %c0_21 = arith.constant 0 : index
    %c0_22 = arith.constant 0 : index
    %48 = vector.load %arg5[%c0_21, %c0_22] : memref<16x128xf32, #tpu.memory_space<vmem>>, vector<16x128xf32>
    tpu.vector_store %arg5[%c0_21, %c0_22], %47 {strides = array<i32>} : memref<16x128xf32, #tpu.memory_space<vmem>>, vector<16x128xf32>,
    return
  }
  func.func @transform_0(%arg0: i32) -> (i32, i32) {
    %c0_i32 = arith.constant 0 : i32
    %c0_i32_0 = arith.constant 0 : i32
    return %arg0, %c0_i32 : i32, i32
  }
  func.func @transform_1(%arg0: i32) -> (i32, i32) {
    %c0_i32 = arith.constant 0 : i32
    %c0_i32_0 = arith.constant 0 : i32
    %c0_i32_1 = arith.constant 0 : i32
    return %c0_i32, %c0_i32_0 : i32, i32
  }
  func.func @transform_2(%arg0: i32) -> (i32, i32) {
    %c0_i32 = arith.constant 0 : i32
    %c0_i32_0 = arith.constant 0 : i32
    %c0_i32_1 = arith.constant 0 : i32
    return %c0_i32, %c0_i32_0 : i32, i32
  }
  func.func @transform_3(%arg0: i32) -> (i32, i32) {
    %c0_i32 = arith.constant 0 : i32
    %c0_i32_0 = arith.constant 0 : i32
    %c0_i32_1 = arith.constant 0 : i32
    return %c0_i32, %c0_i32_0 : i32, i32
  }
  func.func @transform_4(%arg0: i32) -> (i32, i32) {
    %c0_i32 = arith.constant 0 : i32
    %c0_i32_0 = arith.constant 0 : i32
    return %arg0, %c0_i32 : i32, i32
  }
}

module attributes {stable_mosaic.version = 11 : i64} {
  func.func @_ffn_kernel(%arg0: i32, %arg1: memref<16x128xf32, #tpu.memory_space<vmem>>, %arg2: memref<128x128xf32, #tpu.memory_space<vmem>>, %arg3: memref<128x128xf32, #tpu.memory_space<vmem>>, %arg4: memref<8x128xf32, #tpu.memory_space<vmem>>, %arg5: memref<16x128xf32, #tpu.memory_space<vmem>>) attributes {dimension_semantics = [#tpu.dimension_semantics<parallel>], iteration_bounds = array<i64: 1>, scalar_prefetch = 0 : i64, scratch_operands = 0 : i64, tpu.core_type = #tpu.core_type<tc>, window_params = [{transform_indices = @transform_0, window_bounds = array<i64: 16, 128>}, {pipeline_mode = #tpu.pipeline_mode<synchronous>, transform_indices = @transform_1, window_bounds = array<i64: 128, 128>}, {pipeline_mode = #tpu.pipeline_mode<synchronous>, transform_indices = @transform_2, window_bounds = array<i64: 128, 128>}, {pipeline_mode = #tpu.pipeline_mode<synchronous>, transform_indices = @transform_3, window_bounds = array<i64: 8, 128>}, {transform_indices = @transform_4, window_bounds = array<i64: 16, 128>}]} {
    %c0 = arith.constant 0 : index
    %c0_0 = arith.constant 0 : index
    %0 = vector.load %arg1[%c0, %c0_0] : memref<16x128xf32, #tpu.memory_space<vmem>>, vector<16x128xf32>
    %cst = arith.constant dense<0.000000e+00> : vector<16xf32>
    %1 = vector.multi_reduction <add>, %0, %cst [1] : vector<16x128xf32> to vector<16xf32>
    %2 = vector.shape_cast %1 : vector<16xf32> to vector<16x1xf32>
    %cst_1 = arith.constant 3.125000e-02 : f32
    %3 = vector.broadcast %cst_1 : f32 to vector<16x1xf32>
    %4 = arith.mulf %2, %3 : vector<16x1xf32>
    %5 = vector.broadcast %4 : vector<16x1xf32> to vector<16x128xf32>
    %6 = arith.subf %0, %5 : vector<16x128xf32>
    %7 = arith.mulf %6, %6 : vector<16x128xf32>
    %cst_2 = arith.constant dense<0.000000e+00> : vector<16xf32>
    %8 = vector.multi_reduction <add>, %7, %cst_2 [1] : vector<16x128xf32> to vector<16xf32>
    %9 = vector.shape_cast %8 : vector<16xf32> to vector<16x1xf32>
    %cst_3 = arith.constant 9.600000e+01 : f32
    %10 = vector.broadcast %cst_3 : f32 to vector<16x1xf32>
    %11 = arith.mulf %10, %4 : vector<16x1xf32>
    %12 = arith.mulf %11, %4 : vector<16x1xf32>
    %13 = arith.subf %9, %12 : vector<16x1xf32>
    %cst_4 = arith.constant 3.125000e-02 : f32
    %14 = vector.broadcast %cst_4 : f32 to vector<16x1xf32>
    %15 = arith.mulf %13, %14 : vector<16x1xf32>
    %cst_5 = arith.constant 0.000000e+00 : f32
    %16 = vector.broadcast %cst_5 : f32 to vector<16x1xf32>
    %17 = arith.maximumf %15, %16 : vector<16x1xf32>
    %cst_6 = arith.constant 9.99999993E-9 : f32
    %18 = vector.broadcast %cst_6 : f32 to vector<16x1xf32>
    %19 = arith.addf %17, %18 : vector<16x1xf32>
    %20 = math.rsqrt %19 : vector<16x1xf32>
    %21 = vector.broadcast %20 : vector<16x1xf32> to vector<16x128xf32>
    %22 = arith.mulf %6, %21 : vector<16x128xf32>
    %c0_7 = arith.constant 0 : index
    %c0_8 = arith.constant 0 : index
    %23 = vector.load %arg4[%c0_7, %c0_8] : memref<8x128xf32, #tpu.memory_space<vmem>>, vector<1x128xf32>
    %c1 = arith.constant 1 : index
    %c0_9 = arith.constant 0 : index
    %24 = vector.load %arg4[%c1, %c0_9] : memref<8x128xf32, #tpu.memory_space<vmem>>, vector<1x128xf32>
    %c2 = arith.constant 2 : index
    %c0_10 = arith.constant 0 : index
    %25 = vector.load %arg4[%c2, %c0_10] : memref<8x128xf32, #tpu.memory_space<vmem>>, vector<1x128xf32>
    %c3 = arith.constant 3 : index
    %c0_11 = arith.constant 0 : index
    %26 = vector.load %arg4[%c3, %c0_11] : memref<8x128xf32, #tpu.memory_space<vmem>>, vector<1x128xf32>
    %c4 = arith.constant 4 : index
    %c0_12 = arith.constant 0 : index
    %27 = vector.load %arg4[%c4, %c0_12] : memref<8x128xf32, #tpu.memory_space<vmem>>, vector<1x128xf32>
    %c5 = arith.constant 5 : index
    %c0_13 = arith.constant 0 : index
    %28 = vector.load %arg4[%c5, %c0_13] : memref<8x128xf32, #tpu.memory_space<vmem>>, vector<1x128xf32>
    %29 = vector.broadcast %23 : vector<1x128xf32> to vector<16x128xf32>
    %30 = arith.mulf %22, %29 : vector<16x128xf32>
    %31 = vector.broadcast %24 : vector<1x128xf32> to vector<16x128xf32>
    %32 = arith.addf %30, %31 : vector<16x128xf32>
    %c0_14 = arith.constant 0 : index
    %c0_15 = arith.constant 0 : index
    %33 = vector.load %arg2[%c0_14, %c0_15] : memref<128x128xf32, #tpu.memory_space<vmem>>, vector<128x128xf32>
    %cst_16 = arith.constant dense<0.000000e+00> : vector<16x128xf32>
    %34 = tpu.matmul %32, %33, %cst_16 {dimension_numbers = #tpu.dot_dimension_numbers<[1], [0], [0], [1], [0, 0, 1, 1], [], []>} : vector<16x128xf32>, vector<128x128xf32>, vector<16x128xf32> -> vector<16x128xf32>
    %35 = vector.broadcast %25 : vector<1x128xf32> to vector<16x128xf32>
    %36 = arith.addf %34, %35 : vector<16x128xf32>
    %cst_17 = arith.constant 0.000000e+00 : f32
    %37 = vector.broadcast %cst_17 : f32 to vector<16x128xf32>
    %38 = arith.maximumf %36, %37 : vector<16x128xf32>
    %c0_18 = arith.constant 0 : index
    %c0_19 = arith.constant 0 : index
    %39 = vector.load %arg3[%c0_18, %c0_19] : memref<128x128xf32, #tpu.memory_space<vmem>>, vector<128x128xf32>
    %cst_20 = arith.constant dense<0.000000e+00> : vector<16x128xf32>
    %40 = tpu.matmul %38, %39, %cst_20 {dimension_numbers = #tpu.dot_dimension_numbers<[1], [0], [0], [1], [0, 0, 1, 1], [], []>} : vector<16x128xf32>, vector<128x128xf32>, vector<16x128xf32> -> vector<16x128xf32>
    %41 = vector.broadcast %28 : vector<1x128xf32> to vector<16x128xf32>
    %42 = arith.addf %40, %41 : vector<16x128xf32>
    %43 = vector.broadcast %26 : vector<1x128xf32> to vector<16x128xf32>
    %44 = arith.mulf %22, %43 : vector<16x128xf32>
    %45 = vector.broadcast %27 : vector<1x128xf32> to vector<16x128xf32>
    %46 = arith.addf %44, %45 : vector<16x128xf32>
    %47 = arith.addf %42, %46 : vector<16x128xf32>
    %c0_21 = arith.constant 0 : index
    %c0_22 = arith.constant 0 : index
    %48 = vector.load %arg5[%c0_21, %c0_22] : memref<16x128xf32, #tpu.memory_space<vmem>>, vector<16x128xf32>
    tpu.vector_store %arg5[%c0_21, %c0_22], %47 {strides = array<i32>} : memref<16x128xf32, #tpu.memory_space<vmem>>, vector<16x128xf32>,
    return
  }
  func.func @transform_0(%arg0: i32) -> (i32, i32) {
    %c0_i32 = arith.constant 0 : i32
    %c0_i32_0 = arith.constant 0 : i32
    return %arg0, %c0_i32 : i32, i32
  }
  func.func @transform_1(%arg0: i32) -> (i32, i32) {
    %c0_i32 = arith.constant 0 : i32
    %c0_i32_0 = arith.constant 0 : i32
    %c0_i32_1 = arith.constant 0 : i32
    return %c0_i32, %c0_i32_0 : i32, i32
  }
  func.func @transform_2(%arg0: i32) -> (i32, i32) {
    %c0_i32 = arith.constant 0 : i32
    %c0_i32_0 = arith.constant 0 : i32
    %c0_i32_1 = arith.constant 0 : i32
    return %c0_i32, %c0_i32_0 : i32, i32
  }
  func.func @transform_3(%arg0: i32) -> (i32, i32) {
    %c0_i32 = arith.constant 0 : i32
    %c0_i32_0 = arith.constant 0 : i32
    %c0_i32_1 = arith.constant 0 : i32
    return %c0_i32, %c0_i32_0 : i32, i32
  }
  func.func @transform_4(%arg0: i32) -> (i32, i32) {
    %c0_i32 = arith.constant 0 : i32
    %c0_i32_0 = arith.constant 0 : i32
    return %arg0, %c0_i32 : i32, i32
  }
}

</mosaic_0001>

<bundles_post_ra>
// kernel: tpu_custom_call.1
= control target key start
LH: loop header
LB: loop body
LE: loop exit
PB: predicated region body
PF: predicated region fallthrough
CT: control target
= control target key end

     0   :  { %9 = vsyncpa [#allocation3], 0  ;;  %s751_s0 = inlined_call_operand.hbm [shape: f32[16,128], index: 0, kind: input, shape index: {}]   ;;  %s752_s1 = inlined_call_operand.hbm [shape: f32[128,128], index: 1, kind: input, shape index: {}]   ;;  %s753_s2 = inlined_call_operand.hbm [shape: f32[128,128], index: 2, kind: input, shape index: {}]   ;;  %s754_s3 = inlined_call_operand.vmem [shape: f32[8,128], index: 3, kind: input, shape index: {}]   ;;  %s755_s4 = inlined_call_operand.hbm [shape: f32[16,128], index: 4, kind: output, shape index: {}]  }
   0x1   :  { %10 = vsyncpa [#allocation6], 0 }
   0x2   :  { %11 = vsyncpa [#allocation4], 0  ;;  %s615_s15 = smov [#allocation5]   ;;  %s616_s17 = smov [#allocation2]  }
   0x3   :  { %s29_s16 = sshll.u32 %s615_s15, 4  ;;  %s17_s18 = sshll.u32 %s616_s17, 4  ;;  %s30_s16 = int_to_ptr.vmem [resolvable:$true] %s29_s16  ;;  %s646_s18 = int_to_ptr.vmem [resolvable:$true] %s17_s18 }
   0x4   :  { %s521_s21 = scalar_lea.hbm %s752_s1, 2048 }
   0x5   :  { %p522_p0 = scmp.ne.s32.totalorder %s752_s1, %s521_s21  ;;  %p525_p1 = scmp.lt.u32.totalorder %s521_s21, %s752_s1 }
   0x7   :  { %p527_p2 = pnand %p525_p1, %p522_p0 }
   0x9   :  { %530 = shalt.err (!%p527_p2)
}
   0xa   :  { %s531_s26 = scalar_lea.vmem %s30_s16, 2048  ;;  %p536_p4 = scmp.lt.s32.totalorder %s30_s16, %s30_s16 }
   0xb   :  { %p532_p3 = scmp.ne.s32.totalorder %s30_s16, %s531_s26  ;;  %p537_p5 = scmp.lt.s32.totalorder %s531_s26, %s531_s26 }
   0xd   :  { %p538_p6 = por %p537_p5, %p536_p4 }
   0xf   :  { %p539_p7 = pnand %p538_p6, %p532_p3 }
  0x11   :  { %542 = shalt.err (!%p539_p7)
}
  0x12   :  { %s617_s27 = smov 128   ;;  %s618_s28 = smov 8  }
  0x13   :  { %35 = dma.hbm_to_vmem [thread:$0]  %s752_s1, 2048, %s30_s16, [#allocation6], %s617_s27, %s617_s27, %s618_s28  }
  0x14   :  { %s543_s7 = scalar_lea.hbm %s751_s0, 256 }
  0x15   :  { %p544_p8 = scmp.ne.s32.totalorder %s751_s0, %s543_s7  ;;  %p547_p9 = scmp.lt.u32.totalorder %s543_s7, %s751_s0 }
  0x17   :  { %p549_p10 = pnand %p547_p9, %p544_p8 }
  0x19   :  { %552 = shalt.err (!%p549_p10)
}
  0x1a   :  { %s553_s12 = scalar_lea.vmem %s646_s18, 256  ;;  %p558_p12 = scmp.lt.s32.totalorder %s646_s18, %s646_s18 }
  0x1b   :  { %p554_p11 = scmp.ne.s32.totalorder %s646_s18, %s553_s12  ;;  %p559_p13 = scmp.lt.s32.totalorder %s553_s12, %s553_s12 }
  0x1d   :  { %p560_p0 = por %p559_p13, %p558_p12 }
  0x1f   :  { %p561_p1 = pnand %p560_p0, %p554_p11 }
  0x21   :  { %564 = shalt.err (!%p561_p1)
}
  0x22   :  { %23 = dma.hbm_to_vmem [thread:$0]  %s751_s0, 256, %s646_s18, [#allocation3], %s617_s27, %s617_s27, %s618_s28  }
  0x23   :  { %s619_s14 = smov [#allocation7]   ;;  %s565_s19 = scalar_lea.hbm %s753_s2, 2048 }
  0x24   :  { %s41_s15 = sshll.u32 %s619_s14, 4  ;;  %p566_p2 = scmp.ne.s32.totalorder %s753_s2, %s565_s19  ;;  %s42_s15 = int_to_ptr.vmem [resolvable:$true] %s41_s15 }
  0x25   :  { %p569_p3 = scmp.lt.u32.totalorder %s565_s19, %s753_s2 }
  0x27   :  { %p571_p4 = pnand %p569_p3, %p566_p2 }
  0x29   :  { %574 = shalt.err (!%p571_p4)
}
  0x2a   :  { %s575_s24 = scalar_lea.vmem %s42_s15, 2048  ;;  %p580_p6 = scmp.lt.s32.totalorder %s42_s15, %s42_s15 }
  0x2b   :  { %p576_p5 = scmp.ne.s32.totalorder %s42_s15, %s575_s24  ;;  %p581_p7 = scmp.lt.s32.totalorder %s575_s24, %s575_s24 }
  0x2d   :  { %p582_p8 = por %p581_p7, %p580_p6 }
  0x2f   :  { %p583_p9 = pnand %p582_p8, %p576_p5 }
  0x31   :  { %586 = shalt.err (!%p583_p9)
}
  0x32   :  { %47 = dma.hbm_to_vmem [thread:$0]  %s753_s2, 2048, %s42_s15, [#allocation6], %s617_s27, %s617_s27, %s618_s28  }
  0x33   :  { %609 = dma.done.wait [#allocation3], 256  }
  0x34   :  { %610 = vsyncadd [#allocation3], 4294967040 }
  0x35   :  { %611 = dma.done.wait [#allocation6], 4096  }
  0x36   :  { %612 = vsyncadd [#allocation6], 4294963200  ;;  %v59_v0 = vld [vmem:[#allocation2] sm:$0xff]  ;;  %v60_v1 = vld [vmem:[#allocation2 + $0x8] sm:$0xff]  ;;  %s620_s12 = smov [#allocation8]  }
  0x37   :  { %61 = vadd.xlane.f32.xlu0 %v59_v0  ;;  %v109_v2 = vld [vmem:[#allocation5] sm:$0xff]  ;;  %v110_v3 = vld [vmem:[#allocation5 + $0x8] sm:$0xff]  ;;  %v111_v13 = vld [vmem:[#allocation5 + $0x10] sm:$0xff]  ;;  %s322_s1 = sshll.u32 %s620_s12, 4  ;;  %s323_s1 = int_to_ptr.vmem [resolvable:$true] %s322_s1 }
  0x38   :  { %v447_v4 = vpack.c.bf16 %v110_v3, %v109_v2  ;;  %v112_v14 = vld [vmem:[#allocation5 + $0x18] sm:$0xff]  ;;  %v113_v16 = vld [vmem:[#allocation5 + $0x20] sm:$0xff]  ;;  %v114_v17 = vld [vmem:[#allocation5 + $0x28] sm:$0xff]  ;;  %s587_s13 = scalar_lea.vmem %s323_s1, 256  ;;  %p592_p11 = scmp.lt.s32.totalorder %s323_s1, %s323_s1 }
  0x39   :  { %v451_v15 = vpack.c.bf16 %v112_v14, %v111_v13  ;;  %v455_v18 = vpack.c.bf16 %v114_v17, %v113_v16  ;;  %v115_v19 = vld [vmem:[#allocation5 + $0x30] sm:$0xff]  ;;  %v116_v20 = vld [vmem:[#allocation5 + $0x38] sm:$0xff]  ;;  %v117_v22 = vld [vmem:[#allocation5 + $0x40] sm:$0xff]  ;;  %p588_p10 = scmp.ne.s32.totalorder %s323_s1, %s587_s13  ;;  %p593_p12 = scmp.lt.s32.totalorder %s587_s13, %s587_s13 }
  0x3a   :  { %448 = vmatprep.subr.bf16.mxu0 %v447_v4  ;;  %v459_v21 = vpack.c.bf16 %v116_v20, %v115_v19  ;;  %v118_v23 = vld [vmem:[#allocation5 + $0x48] sm:$0xff]  ;;  %v119_v25 = vld [vmem:[#allocation5 + $0x50] sm:$0xff]  ;;  %v120_v26 = vld [vmem:[#allocation5 + $0x58] sm:$0xff] }
  0x3b   :  { %63 = vadd.xlane.f32.xlu0 %v60_v1  ;;  %450 = vmatpush3.bf16.msra.mxu0 %v447_v4  ;;  %v463_v24 = vpack.c.bf16 %v118_v23, %v117_v22  ;;  %v121_v27 = vld [vmem:[#allocation5 + $0x60] sm:$0xff]  ;;  %v467_v28 = vpack.c.bf16 %v120_v26, %v119_v25  ;;  %v122_v29 = vld [vmem:[#allocation5 + $0x68] sm:$0xff]  ;;  %v123_v31 = vld [vmem:[#allocation5 + $0x70] sm:$0xff]  ;;  %p594_p13 = por %p593_p12, %p592_p11 }
  0x3c   :  { %452 = vmatprep.subr.bf16.mxu0 %v451_v15  ;;  %v471_v30 = vpack.c.bf16 %v122_v29, %v121_v27  ;;  %v124_v32 = vld [vmem:[#allocation5 + $0x78] sm:$0xff]  ;;  %v206_v34 = vld [vmem:[#allocation7] sm:$0xff]  ;;  %v207_v35 = vld [vmem:[#allocation7 + $0x8] sm:$0xff] }
  0x3d   :  { %v475_v33 = vpack.c.bf16 %v124_v32, %v123_v31  ;;  %v208_v36 = vld [vmem:[#allocation7 + $0x10] sm:$0xff]  ;;  %v479_v37 = vpack.c.bf16 %v207_v35, %v206_v34  ;;  %v209_v38 = vld [vmem:[#allocation7 + $0x18] sm:$0xff]  ;;  %v210_v40 = vld [vmem:[#allocation7 + $0x20] sm:$0xff]  ;;  %p595_p0 = pnand %p594_p13, %p588_p10 }
  0x3e   :  { %v483_v39 = vpack.c.bf16 %v209_v38, %v208_v36  ;;  %v211_v41 = vld [vmem:[#allocation7 + $0x28] sm:$0xff]  ;;  %v212_v43 = vld [vmem:[#allocation7 + $0x30] sm:$0xff]  ;;  %v213_v44 = vld [vmem:[#allocation7 + $0x38] sm:$0xff] }
  0x3f   :  { %454 = vmatpush3.bf16.msra.mxu0 %v451_v15  ;;  %480 = vmatprep.subr.bf16.mxu1 %v479_v37  ;;  %v487_v42 = vpack.c.bf16 %v211_v41, %v210_v40  ;;  %v491_v45 = vpack.c.bf16 %v213_v44, %v212_v43  ;;  %v214_v46 = vld [vmem:[#allocation7 + $0x40] sm:$0xff]  ;;  %v215_v47 = vld [vmem:[#allocation7 + $0x48] sm:$0xff]  ;;  %v216_v49 = vld [vmem:[#allocation7 + $0x50] sm:$0xff] }
  0x40   :  { %456 = vmatprep.subr.bf16.mxu0 %v455_v18  ;;  %482 = vmatpush3.bf16.msra.mxu1 %v479_v37  ;;  %v495_v48 = vpack.c.bf16 %v215_v47, %v214_v46  ;;  %v217_v50 = vld [vmem:[#allocation7 + $0x58] sm:$0xff]  ;;  %v218_v52 = vld [vmem:[#allocation7 + $0x60] sm:$0xff]  ;;  %v219_v53 = vld [vmem:[#allocation7 + $0x68] sm:$0xff] }
  0x41   :  { %484 = vmatprep.subr.bf16.mxu1 %v483_v39  ;;  %v499_v51 = vpack.c.bf16 %v217_v50, %v216_v49  ;;  %v503_v54 = vpack.c.bf16 %v219_v53, %v218_v52  ;;  %v220_v17 = vld [vmem:[#allocation7 + $0x70] sm:$0xff] }
  0x42   :  { %v339_v25 = vld [vmem:[%s754_s3 + $0x3] ss:$0 sm:$0xff]  ;;  %v340_v29 = vld [vmem:[%s754_s3 + $0x4] ss:$0 sm:$0xff] }
  0x43   :  { %458 = vmatpush3.bf16.msra.mxu0 %v455_v18  ;;  %v221_v18 = vld [vmem:[#allocation7 + $0x78] sm:$0xff] }
  0x44   :  { %460 = vmatprep.subr.bf16.mxu0 %v459_v21  ;;  %486 = vmatpush3.bf16.msra.mxu1 %v483_v39  ;;  %v507_v19 = vpack.c.bf16 %v221_v18, %v220_v17 }
  0x45   :  { %488 = vmatprep.subr.bf16.mxu1 %v487_v42 }
  0x47   :  { %462 = vmatpush3.bf16.msra.mxu0 %v459_v21 }
  0x48   :  { %464 = vmatprep.subr.bf16.mxu0 %v463_v24  ;;  %490 = vmatpush3.bf16.msra.mxu1 %v487_v42 }
  0x49   :  { %492 = vmatprep.subr.bf16.mxu1 %v491_v45 }
  0x4b   :  { %466 = vmatpush3.bf16.msra.mxu0 %v463_v24 }
  0x4c   :  { %468 = vmatprep.subr.bf16.mxu0 %v467_v28  ;;  %494 = vmatpush3.bf16.msra.mxu1 %v491_v45 }
  0x4d   :  { %496 = vmatprep.subr.bf16.mxu1 %v495_v48 }
  0x4f   :  { %470 = vmatpush3.bf16.msra.mxu0 %v467_v28  ;;  %v338_v28 = vld [vmem:[%s754_s3 + $0x5] ss:$0 sm:$0xff] }
  0x50   :  { %472 = vmatprep.subr.bf16.mxu0 %v471_v30  ;;  %498 = vmatpush3.bf16.msra.mxu1 %v495_v48 }
  0x51   :  { %500 = vmatprep.subr.bf16.mxu1 %v499_v51 }
  0x53   :  { %474 = vmatpush3.bf16.msra.mxu0 %v471_v30 }
  0x54   :  { %476 = vmatprep.subr.bf16.mxu0 %v475_v33  ;;  %502 = vmatpush3.bf16.msra.mxu1 %v499_v51 }
  0x55   :  { %504 = vmatprep.subr.bf16.mxu1 %v503_v54 }
  0x57   :  { %478 = vmatpush3.bf16.msra.mxu0 %v475_v33 }
  0x58   :  { %506 = vmatpush3.bf16.msra.mxu1 %v503_v54 }
  0x59   :  { %508 = vmatprep.subr.bf16.mxu1 %v507_v19 }
  0x5c   :  { %510 = vmatpush3.bf16.msra.mxu1 %v507_v19 }
  0xc4   :  { %v62_v5 = vpop.xlane.xlu0 %61 }
  0xc5   :  { %v698_v6 = vmul.f32 0.03125, %v62_v5 }
  0xc7   :  { %v701_v7 = vsub.f32 %v59_v0, %v698_v6  ;;  %v75_v55 = vmul.f32 96.0, %v698_v6 }
  0xc8   :  { %v64_v8 = vpop.xlane.xlu0 %63 }
  0xc9   :  { %v703_v9 = vmul.f32 0.03125, %v64_v8  ;;  %v69_v10 = vmul.f32 %v701_v7, %v701_v7  ;;  %v77_v57 = vmul.f32 %v75_v55, %v698_v6  ;;  %v335_v8 = vld [vmem:[%s754_s3] ss:$0 sm:$0xff] }
  0xcb   :  { %71 = vadd.xlane.f32.xlu1 %v69_v10  ;;  %v708_v11 = vsub.f32 %v60_v1, %v703_v9  ;;  %v76_v56 = vmul.f32 96.0, %v703_v9 }
  0xcd   :  { %v70_v12 = vmul.f32 %v708_v11, %v708_v11  ;;  %v78_v61 = vmul.f32 %v76_v56, %v703_v9  ;;  %v336_v9 = vld [vmem:[%s754_s3 + $0x1] ss:$0 sm:$0xff] }
  0xcf   :  { %73 = vadd.xlane.f32.xlu1 %v70_v12 }
 0x158   :  { %v72_v58 = vpop.xlane.xlu1 %71 }
 0x159   :  { %v79_v59 = vsub.f32 %v72_v58, %v77_v57 }
 0x15b   :  { %v81_v60 = vmul.f32 0.03125, %v79_v59 }
 0x15c   :  { %v74_v62 = vpop.xlane.xlu1 %73 }
 0x15d   :  { %v83_v63 = vmax.f32 %v81_v60, 0.0  ;;  %v80_v0 = vsub.f32 %v74_v62, %v78_v61 }
 0x15f   :  { %v85_v1 = vadd.f32 1e-08, %v83_v63  ;;  %v82_v2 = vmul.f32 0.03125, %v80_v0 }
 0x161   :  { %517 = vrsqrt.f32 %v85_v1  ;;  %v84_v3 = vmax.f32 %v82_v2, 0.0 }
 0x163   :  { %v86_v4 = vadd.f32 1e-08, %v84_v3 }
 0x165   :  { %519 = vrsqrt.f32 %v86_v4 }
 0x16b   :  { %v518_v5 = vpop.eup %517 }
 0x16c   :  { %v89_v6 = vmul.f32 %v518_v5, %v701_v7  ;;  %v337_v7 = vld [vmem:[%s754_s3 + $0x2] ss:$0 sm:$0xff] }
 0x16e   :  { %v101_v10 = vmul.f32 %v335_v8, %v89_v6  ;;  %v305_v27 = vmul.f32 %v339_v25, %v89_v6 }
 0x16f   :  { %v520_v12 = vpop.eup %519 }
 0x170   :  { %v90_v13 = vmul.f32 %v520_v12, %v708_v11  ;;  %v107_v14 = vadd.f32 %v336_v9, %v101_v10  ;;  %v311_v35 = vadd.f32 %v340_v29, %v305_v27 }
 0x172   :  { %v102_v15 = vmul.f32 %v335_v8, %v90_v13  ;;  %409 = vmatprep.mubr.f32.mxu0 %v107_v14  ;;  %v306_v26 = vmul.f32 %v339_v25, %v90_v13 }
 0x174   :  { %v108_v16 = vadd.f32 %v336_v9, %v102_v15  ;;  %v312_v32 = vadd.f32 %v340_v29, %v306_v26 }
 0x176   :  { %410 = vmatmul.mubr.f32.vlgmr.msra.gmra.mrb[0].mxu0 %v108_v16 }
 0x249   :  { %v411_v20 = vpop.f32.mrb[0].mxu0 }
 0x24a   :  { %v201_v21 = vadd.f32 %v411_v20, %v337_v7  ;;  %v195_v22 = vpop.f32.mrb[1].mxu0 }
 0x24b   :  { %v196_v23 = vadd.f32 %v337_v7, %v195_v22 }
 0x24c   :  { %v205_v11 = vmax.f32 %v201_v21, 0.0 }
 0x24d   :  { %v204_v24 = vmax.f32 %v196_v23, 0.0 }
 0x24f   :  { %444 = vmatprep.mubr.f32.mxu1 %v204_v24 }
 0x250   :  { %445 = vmatmul.mubr.f32.vlgmr.msra.gmra.mrb[0].mxu1 %v205_v11 }
 0x323   :  { %v446_v30 = vpop.f32.mrb[0].mxu1 }
 0x324   :  { %v298_v31 = vadd.f32 %v446_v30, %v338_v28  ;;  %v292_v33 = vpop.f32.mrb[1].mxu1 }
 0x325   :  { %v293_v34 = vadd.f32 %v338_v28, %v292_v33 }
 0x326   :  { %v314_v36 = vadd.f32 %v312_v32, %v298_v31 }
 0x327   :  { %v313_v37 = vadd.f32 %v311_v35, %v293_v34 }
 0x328   :  { %316 = vst [vmem:[#allocation8 + $0x8] sm:$0xff] %v314_v36 }
 0x329   :  { %315 = vst [vmem:[#allocation8] sm:$0xff] %v313_v37 }
 0x32a   :  { %598 = shalt.err (!%p595_p0)
}
 0x32b   :  { %s599_s15 = scalar_lea.hbm %s755_s4, 256 }
 0x32c   :  { %p600_p1 = scmp.ne.s32.totalorder %s755_s4, %s599_s15  ;;  %p603_p2 = scmp.lt.u32.totalorder %s599_s15, %s755_s4 }
 0x32e   :  { %p605_p3 = pnand %p603_p2, %p600_p1 }
 0x330   :  { %608 = shalt.err (!%p605_p3)
}
 0x331   :  { %328 = dma.vmem_to_hbm [thread:$0]  %s323_s1, 256, %s755_s4, [#allocation4], %s617_s27, %s617_s27, %s618_s28  }
 0x332   :  { %613 = dma.done.wait [#allocation4], 256  }
 0x333   :  { %614 = vsyncadd [#allocation4], 4294967040 }
 0x334   :  { %332 = vsyncpa [#allocation3], 1 }
 0x335   :  { %333 = vsyncpa [#allocation6], 1 }
 0x336   :  { %334 = vsyncpa [#allocation4], 1 }

// kernel: tpu_custom_call.1
= control target key start
LH: loop header
LB: loop body
LE: loop exit
PB: predicated region body
PF: predicated region fallthrough
CT: control target
= control target key end

     0   :  { %9 = vsyncpa [#allocation3], 0  ;;  %s751_s0 = inlined_call_operand.hbm [shape: f32[16,128], index: 0, kind: input, shape index: {}]   ;;  %s752_s1 = inlined_call_operand.hbm [shape: f32[128,128], index: 1, kind: input, shape index: {}]   ;;  %s753_s2 = inlined_call_operand.hbm [shape: f32[128,128], index: 2, kind: input, shape index: {}]   ;;  %s754_s3 = inlined_call_operand.vmem [shape: f32[8,128], index: 3, kind: input, shape index: {}]   ;;  %s755_s4 = inlined_call_operand.hbm [shape: f32[16,128], index: 4, kind: output, shape index: {}]  }
   0x1   :  { %10 = vsyncpa [#allocation6], 0 }
   0x2   :  { %11 = vsyncpa [#allocation4], 0  ;;  %s615_s15 = smov [#allocation5]   ;;  %s616_s17 = smov [#allocation2]  }
   0x3   :  { %s29_s16 = sshll.u32 %s615_s15, 4  ;;  %s17_s18 = sshll.u32 %s616_s17, 4  ;;  %s30_s16 = int_to_ptr.vmem [resolvable:$true] %s29_s16  ;;  %s646_s18 = int_to_ptr.vmem [resolvable:$true] %s17_s18 }
   0x4   :  { %s521_s21 = scalar_lea.hbm %s752_s1, 2048 }
   0x5   :  { %p522_p0 = scmp.ne.s32.totalorder %s752_s1, %s521_s21  ;;  %p525_p1 = scmp.lt.u32.totalorder %s521_s21, %s752_s1 }
   0x7   :  { %p527_p2 = pnand %p525_p1, %p522_p0 }
   0x9   :  { %530 = shalt.err (!%p527_p2)
}
   0xa   :  { %s531_s26 = scalar_lea.vmem %s30_s16, 2048  ;;  %p536_p4 = scmp.lt.s32.totalorder %s30_s16, %s30_s16 }
   0xb   :  { %p532_p3 = scmp.ne.s32.totalorder %s30_s16, %s531_s26  ;;  %p537_p5 = scmp.lt.s32.totalorder %s531_s26, %s531_s26 }
   0xd   :  { %p538_p6 = por %p537_p5, %p536_p4 }
   0xf   :  { %p539_p7 = pnand %p538_p6, %p532_p3 }
  0x11   :  { %542 = shalt.err (!%p539_p7)
}
  0x12   :  { %s617_s27 = smov 128   ;;  %s618_s28 = smov 8  }
  0x13   :  { %35 = dma.hbm_to_vmem [thread:$0]  %s752_s1, 2048, %s30_s16, [#allocation6], %s617_s27, %s617_s27, %s618_s28  }
  0x14   :  { %s543_s7 = scalar_lea.hbm %s751_s0, 256 }
  0x15   :  { %p544_p8 = scmp.ne.s32.totalorder %s751_s0, %s543_s7  ;;  %p547_p9 = scmp.lt.u32.totalorder %s543_s7, %s751_s0 }
  0x17   :  { %p549_p10 = pnand %p547_p9, %p544_p8 }
  0x19   :  { %552 = shalt.err (!%p549_p10)
}
  0x1a   :  { %s553_s12 = scalar_lea.vmem %s646_s18, 256  ;;  %p558_p12 = scmp.lt.s32.totalorder %s646_s18, %s646_s18 }
  0x1b   :  { %p554_p11 = scmp.ne.s32.totalorder %s646_s18, %s553_s12  ;;  %p559_p13 = scmp.lt.s32.totalorder %s553_s12, %s553_s12 }
  0x1d   :  { %p560_p0 = por %p559_p13, %p558_p12 }
  0x1f   :  { %p561_p1 = pnand %p560_p0, %p554_p11 }
  0x21   :  { %564 = shalt.err (!%p561_p1)
}
  0x22   :  { %23 = dma.hbm_to_vmem [thread:$0]  %s751_s0, 256, %s646_s18, [#allocation3], %s617_s27, %s617_s27, %s618_s28  }
  0x23   :  { %s619_s14 = smov [#allocation7]   ;;  %s565_s19 = scalar_lea.hbm %s753_s2, 2048 }
  0x24   :  { %s41_s15 = sshll.u32 %s619_s14, 4  ;;  %p566_p2 = scmp.ne.s32.totalorder %s753_s2, %s565_s19  ;;  %s42_s15 = int_to_ptr.vmem [resolvable:$true] %s41_s15 }
  0x25   :  { %p569_p3 = scmp.lt.u32.totalorder %s565_s19, %s753_s2 }
  0x27   :  { %p571_p4 = pnand %p569_p3, %p566_p2 }
  0x29   :  { %574 = shalt.err (!%p571_p4)
}
  0x2a   :  { %s575_s24 = scalar_lea.vmem %s42_s15, 2048  ;;  %p580_p6 = scmp.lt.s32.totalorder %s42_s15, %s42_s15 }
  0x2b   :  { %p576_p5 = scmp.ne.s32.totalorder %s42_s15, %s575_s24  ;;  %p581_p7 = scmp.lt.s32.totalorder %s575_s24, %s575_s24 }
  0x2d   :  { %p582_p8 = por %p581_p7, %p580_p6 }
  0x2f   :  { %p583_p9 = pnand %p582_p8, %p576_p5 }
  0x31   :  { %586 = shalt.err (!%p583_p9)
}
  0x32   :  { %47 = dma.hbm_to_vmem [thread:$0]  %s753_s2, 2048, %s42_s15, [#allocation6], %s617_s27, %s617_s27, %s618_s28  }
  0x33   :  { %609 = dma.done.wait [#allocation3], 256  }
  0x34   :  { %610 = vsyncadd [#allocation3], 4294967040 }
  0x35   :  { %611 = dma.done.wait [#allocation6], 4096  }
  0x36   :  { %612 = vsyncadd [#allocation6], 4294963200  ;;  %v59_v0 = vld [vmem:[#allocation2] sm:$0xff]  ;;  %v60_v1 = vld [vmem:[#allocation2 + $0x8] sm:$0xff]  ;;  %s620_s12 = smov [#allocation8]  }
  0x37   :  { %61 = vadd.xlane.f32.xlu0 %v59_v0  ;;  %v109_v2 = vld [vmem:[#allocation5] sm:$0xff]  ;;  %v110_v3 = vld [vmem:[#allocation5 + $0x8] sm:$0xff]  ;;  %v111_v13 = vld [vmem:[#allocation5 + $0x10] sm:$0xff]  ;;  %s322_s1 = sshll.u32 %s620_s12, 4  ;;  %s323_s1 = int_to_ptr.vmem [resolvable:$true] %s322_s1 }
  0x38   :  { %v447_v4 = vpack.c.bf16 %v110_v3, %v109_v2  ;;  %v112_v14 = vld [vmem:[#allocation5 + $0x18] sm:$0xff]  ;;  %v113_v16 = vld [vmem:[#allocation5 + $0x20] sm:$0xff]  ;;  %v114_v17 = vld [vmem:[#allocation5 + $0x28] sm:$0xff]  ;;  %s587_s13 = scalar_lea.vmem %s323_s1, 256  ;;  %p592_p11 = scmp.lt.s32.totalorder %s323_s1, %s323_s1 }
  0x39   :  { %v451_v15 = vpack.c.bf16 %v112_v14, %v111_v13  ;;  %v455_v18 = vpack.c.bf16 %v114_v17, %v113_v16  ;;  %v115_v19 = vld [vmem:[#allocation5 + $0x30] sm:$0xff]  ;;  %v116_v20 = vld [vmem:[#allocation5 + $0x38] sm:$0xff]  ;;  %v117_v22 = vld [vmem:[#allocation5 + $0x40] sm:$0xff]  ;;  %p588_p10 = scmp.ne.s32.totalorder %s323_s1, %s587_s13  ;;  %p593_p12 = scmp.lt.s32.totalorder %s587_s13, %s587_s13 }
  0x3a   :  { %448 = vmatprep.subr.bf16.mxu0 %v447_v4  ;;  %v459_v21 = vpack.c.bf16 %v116_v20, %v115_v19  ;;  %v118_v23 = vld [vmem:[#allocation5 + $0x48] sm:$0xff]  ;;  %v119_v25 = vld [vmem:[#allocation5 + $0x50] sm:$0xff]  ;;  %v120_v26 = vld [vmem:[#allocation5 + $0x58] sm:$0xff] }
  0x3b   :  { %63 = vadd.xlane.f32.xlu0 %v60_v1  ;;  %450 = vmatpush3.bf16.msra.mxu0 %v447_v4  ;;  %v463_v24 = vpack.c.bf16 %v118_v23, %v117_v22  ;;  %v121_v27 = vld [vmem:[#allocation5 + $0x60] sm:$0xff]  ;;  %v467_v28 = vpack.c.bf16 %v120_v26, %v119_v25  ;;  %v122_v29 = vld [vmem:[#allocation5 + $0x68] sm:$0xff]  ;;  %v123_v31 = vld [vmem:[#allocation5 + $0x70] sm:$0xff]  ;;  %p594_p13 = por %p593_p12, %p592_p11 }
  0x3c   :  { %452 = vmatprep.subr.bf16.mxu0 %v451_v15  ;;  %v471_v30 = vpack.c.bf16 %v122_v29, %v121_v27  ;;  %v124_v32 = vld [vmem:[#allocation5 + $0x78] sm:$0xff]  ;;  %v206_v34 = vld [vmem:[#allocation7] sm:$0xff]  ;;  %v207_v35 = vld [vmem:[#allocation7 + $0x8] sm:$0xff] }
  0x3d   :  { %v475_v33 = vpack.c.bf16 %v124_v32, %v123_v31  ;;  %v208_v36 = vld [vmem:[#allocation7 + $0x10] sm:$0xff]  ;;  %v479_v37 = vpack.c.bf16 %v207_v35, %v206_v34  ;;  %v209_v38 = vld [vmem:[#allocation7 + $0x18] sm:$0xff]  ;;  %v210_v40 = vld [vmem:[#allocation7 + $0x20] sm:$0xff]  ;;  %p595_p0 = pnand %p594_p13, %p588_p10 }
  0x3e   :  { %v483_v39 = vpack.c.bf16 %v209_v38, %v208_v36  ;;  %v211_v41 = vld [vmem:[#allocation7 + $0x28] sm:$0xff]  ;;  %v212_v43 = vld [vmem:[#allocation7 + $0x30] sm:$0xff]  ;;  %v213_v44 = vld [vmem:[#allocation7 + $0x38] sm:$0xff] }
  0x3f   :  { %454 = vmatpush3.bf16.msra.mxu0 %v451_v15  ;;  %480 = vmatprep.subr.bf16.mxu1 %v479_v37  ;;  %v487_v42 = vpack.c.bf16 %v211_v41, %v210_v40  ;;  %v491_v45 = vpack.c.bf16 %v213_v44, %v212_v43  ;;  %v214_v46 = vld [vmem:[#allocation7 + $0x40] sm:$0xff]  ;;  %v215_v47 = vld [vmem:[#allocation7 + $0x48] sm:$0xff]  ;;  %v216_v49 = vld [vmem:[#allocation7 + $0x50] sm:$0xff] }
  0x40   :  { %456 = vmatprep.subr.bf16.mxu0 %v455_v18  ;;  %482 = vmatpush3.bf16.msra.mxu1 %v479_v37  ;;  %v495_v48 = vpack.c.bf16 %v215_v47, %v214_v46  ;;  %v217_v50 = vld [vmem:[#allocation7 + $0x58] sm:$0xff]  ;;  %v218_v52 = vld [vmem:[#allocation7 + $0x60] sm:$0xff]  ;;  %v219_v53 = vld [vmem:[#allocation7 + $0x68] sm:$0xff] }
  0x41   :  { %484 = vmatprep.subr.bf16.mxu1 %v483_v39  ;;  %v499_v51 = vpack.c.bf16 %v217_v50, %v216_v49  ;;  %v503_v54 = vpack.c.bf16 %v219_v53, %v218_v52  ;;  %v220_v17 = vld [vmem:[#allocation7 + $0x70] sm:$0xff] }
  0x42   :  { %v339_v25 = vld [vmem:[%s754_s3 + $0x3] ss:$0 sm:$0xff]  ;;  %v340_v29 = vld [vmem:[%s754_s3 + $0x4] ss:$0 sm:$0xff] }
  0x43   :  { %458 = vmatpush3.bf16.msra.mxu0 %v455_v18  ;;  %v221_v18 = vld [vmem:[#allocation7 + $0x78] sm:$0xff] }
  0x44   :  { %460 = vmatprep.subr.bf16.mxu0 %v459_v21  ;;  %486 = vmatpush3.bf16.msra.mxu1 %v483_v39  ;;  %v507_v19 = vpack.c.bf16 %v221_v18, %v220_v17 }
  0x45   :  { %488 = vmatprep.subr.bf16.mxu1 %v487_v42 }
  0x47   :  { %462 = vmatpush3.bf16.msra.mxu0 %v459_v21 }
  0x48   :  { %464 = vmatprep.subr.bf16.mxu0 %v463_v24  ;;  %490 = vmatpush3.bf16.msra.mxu1 %v487_v42 }
  0x49   :  { %492 = vmatprep.subr.bf16.mxu1 %v491_v45 }
  0x4b   :  { %466 = vmatpush3.bf16.msra.mxu0 %v463_v24 }
  0x4c   :  { %468 = vmatprep.subr.bf16.mxu0 %v467_v28  ;;  %494 = vmatpush3.bf16.msra.mxu1 %v491_v45 }
  0x4d   :  { %496 = vmatprep.subr.bf16.mxu1 %v495_v48 }
  0x4f   :  { %470 = vmatpush3.bf16.msra.mxu0 %v467_v28  ;;  %v338_v28 = vld [vmem:[%s754_s3 + $0x5] ss:$0 sm:$0xff] }
  0x50   :  { %472 = vmatprep.subr.bf16.mxu0 %v471_v30  ;;  %498 = vmatpush3.bf16.msra.mxu1 %v495_v48 }
  0x51   :  { %500 = vmatprep.subr.bf16.mxu1 %v499_v51 }
  0x53   :  { %474 = vmatpush3.bf16.msra.mxu0 %v471_v30 }
  0x54   :  { %476 = vmatprep.subr.bf16.mxu0 %v475_v33  ;;  %502 = vmatpush3.bf16.msra.mxu1 %v499_v51 }
  0x55   :  { %504 = vmatprep.subr.bf16.mxu1 %v503_v54 }
  0x57   :  { %478 = vmatpush3.bf16.msra.mxu0 %v475_v33 }
  0x58   :  { %506 = vmatpush3.bf16.msra.mxu1 %v503_v54 }
  0x59   :  { %508 = vmatprep.subr.bf16.mxu1 %v507_v19 }
  0x5c   :  { %510 = vmatpush3.bf16.msra.mxu1 %v507_v19 }
  0xc4   :  { %v62_v5 = vpop.xlane.xlu0 %61 }
  0xc5   :  { %v698_v6 = vmul.f32 0.03125, %v62_v5 }
  0xc7   :  { %v701_v7 = vsub.f32 %v59_v0, %v698_v6  ;;  %v75_v55 = vmul.f32 96.0, %v698_v6 }
  0xc8   :  { %v64_v8 = vpop.xlane.xlu0 %63 }
  0xc9   :  { %v703_v9 = vmul.f32 0.03125, %v64_v8  ;;  %v69_v10 = vmul.f32 %v701_v7, %v701_v7  ;;  %v77_v57 = vmul.f32 %v75_v55, %v698_v6  ;;  %v335_v8 = vld [vmem:[%s754_s3] ss:$0 sm:$0xff] }
  0xcb   :  { %71 = vadd.xlane.f32.xlu1 %v69_v10  ;;  %v708_v11 = vsub.f32 %v60_v1, %v703_v9  ;;  %v76_v56 = vmul.f32 96.0, %v703_v9 }
  0xcd   :  { %v70_v12 = vmul.f32 %v708_v11, %v708_v11  ;;  %v78_v61 = vmul.f32 %v76_v56, %v703_v9  ;;  %v336_v9 = vld [vmem:[%s754_s3 + $0x1] ss:$0 sm:$0xff] }
  0xcf   :  { %73 = vadd.xlane.f32.xlu1 %v70_v12 }
 0x158   :  { %v72_v58 = vpop.xlane.xlu1 %71 }
 0x159   :  { %v79_v59 = vsub.f32 %v72_v58, %v77_v57 }
 0x15b   :  { %v81_v60 = vmul.f32 0.03125, %v79_v59 }
 0x15c   :  { %v74_v62 = vpop.xlane.xlu1 %73 }
 0x15d   :  { %v83_v63 = vmax.f32 %v81_v60, 0.0  ;;  %v80_v0 = vsub.f32 %v74_v62, %v78_v61 }
 0x15f   :  { %v85_v1 = vadd.f32 1e-08, %v83_v63  ;;  %v82_v2 = vmul.f32 0.03125, %v80_v0 }
 0x161   :  { %517 = vrsqrt.f32 %v85_v1  ;;  %v84_v3 = vmax.f32 %v82_v2, 0.0 }
 0x163   :  { %v86_v4 = vadd.f32 1e-08, %v84_v3 }
 0x165   :  { %519 = vrsqrt.f32 %v86_v4 }
 0x16b   :  { %v518_v5 = vpop.eup %517 }
 0x16c   :  { %v89_v6 = vmul.f32 %v518_v5, %v701_v7  ;;  %v337_v7 = vld [vmem:[%s754_s3 + $0x2] ss:$0 sm:$0xff] }
 0x16e   :  { %v101_v10 = vmul.f32 %v335_v8, %v89_v6  ;;  %v305_v27 = vmul.f32 %v339_v25, %v89_v6 }
 0x16f   :  { %v520_v12 = vpop.eup %519 }
 0x170   :  { %v90_v13 = vmul.f32 %v520_v12, %v708_v11  ;;  %v107_v14 = vadd.f32 %v336_v9, %v101_v10  ;;  %v311_v35 = vadd.f32 %v340_v29, %v305_v27 }
 0x172   :  { %v102_v15 = vmul.f32 %v335_v8, %v90_v13  ;;  %409 = vmatprep.mubr.f32.mxu0 %v107_v14  ;;  %v306_v26 = vmul.f32 %v339_v25, %v90_v13 }
 0x174   :  { %v108_v16 = vadd.f32 %v336_v9, %v102_v15  ;;  %v312_v32 = vadd.f32 %v340_v29, %v306_v26 }
 0x176   :  { %410 = vmatmul.mubr.f32.vlgmr.msra.gmra.mrb[0].mxu0 %v108_v16 }
 0x249   :  { %v411_v20 = vpop.f32.mrb[0].mxu0 }
 0x24a   :  { %v201_v21 = vadd.f32 %v411_v20, %v337_v7  ;;  %v195_v22 = vpop.f32.mrb[1].mxu0 }
 0x24b   :  { %v196_v23 = vadd.f32 %v337_v7, %v195_v22 }
 0x24c   :  { %v205_v11 = vmax.f32 %v201_v21, 0.0 }
 0x24d   :  { %v204_v24 = vmax.f32 %v196_v23, 0.0 }
 0x24f   :  { %444 = vmatprep.mubr.f32.mxu1 %v204_v24 }
 0x250   :  { %445 = vmatmul.mubr.f32.vlgmr.msra.gmra.mrb[0].mxu1 %v205_v11 }
 0x323   :  { %v446_v30 = vpop.f32.mrb[0].mxu1 }
 0x324   :  { %v298_v31 = vadd.f32 %v446_v30, %v338_v28  ;;  %v292_v33 = vpop.f32.mrb[1].mxu1 }
 0x325   :  { %v293_v34 = vadd.f32 %v338_v28, %v292_v33 }
 0x326   :  { %v314_v36 = vadd.f32 %v312_v32, %v298_v31 }
 0x327   :  { %v313_v37 = vadd.f32 %v311_v35, %v293_v34 }
 0x328   :  { %316 = vst [vmem:[#allocation8 + $0x8] sm:$0xff] %v314_v36 }
 0x329   :  { %315 = vst [vmem:[#allocation8] sm:$0xff] %v313_v37 }
 0x32a   :  { %598 = shalt.err (!%p595_p0)
}
 0x32b   :  { %s599_s15 = scalar_lea.hbm %s755_s4, 256 }
 0x32c   :  { %p600_p1 = scmp.ne.s32.totalorder %s755_s4, %s599_s15  ;;  %p603_p2 = scmp.lt.u32.totalorder %s599_s15, %s755_s4 }
 0x32e   :  { %p605_p3 = pnand %p603_p2, %p600_p1 }
 0x330   :  { %608 = shalt.err (!%p605_p3)
}
 0x331   :  { %328 = dma.vmem_to_hbm [thread:$0]  %s323_s1, 256, %s755_s4, [#allocation4], %s617_s27, %s617_s27, %s618_s28  }
 0x332   :  { %613 = dma.done.wait [#allocation4], 256  }
 0x333   :  { %614 = vsyncadd [#allocation4], 4294967040 }
 0x334   :  { %332 = vsyncpa [#allocation3], 1 }
 0x335   :  { %333 = vsyncpa [#allocation6], 1 }
 0x336   :  { %334 = vsyncpa [#allocation4], 1 }

</bundles_post_ra>
